<compile_context>
chip_gen: v7x
topology: tpu7x:2x2x1
jax: 0.10.0
libtpu: 0.0.40
codegen_flags: <defaults>
</compile_context>

<pallas_src>
import functools

import jax
import jax.numpy as jnp
from jax.experimental import pallas as pl
from jax.experimental.pallas import tpu as pltpu

_LANE = 128


def _round_up(n, m):
    return ((n + m - 1) // m) * m


def _cdiv(a, b):
    return (a + b - 1) // b


# ----------------------------------------------------------------------------
# Pallas kernel: fused 3-layer MLP on one row block (all dims lane-padded)
# ----------------------------------------------------------------------------
def _fc_relu_reg_kernel(x_ref, w1_ref, b1_ref, w2_ref, b2_ref, w3_ref, b3_ref,
                        o_ref):
    """x: (bm, D); w1: (D, Hp); w2: (Hp, H2p); w3: (H2p, Rp); o: (bm, Rp)."""
    x = x_ref[...]
    h1 = jnp.dot(x, w1_ref[...], preferred_element_type=jnp.float32)
    h1 = jnp.maximum(h1 + b1_ref[...], 0.0)                       # ReLU (VPU, f32)
    h2 = jnp.dot(h1.astype(w2_ref.dtype), w2_ref[...],
                 preferred_element_type=jnp.float32)
    h2 = jnp.maximum(h2 + b2_ref[...], 0.0)                       # ReLU (VPU, f32)
    out = jnp.dot(h2.astype(w3_ref.dtype), w3_ref[...],
                  preferred_element_type=jnp.float32)
    o_ref[...] = out + b3_ref[...]                                # lane-dense store


# ----------------------------------------------------------------------------
# Wrapper
# ----------------------------------------------------------------------------
def _pad_last(a, target):
    pad = target - a.shape[-1]
    if pad:
        a = jnp.pad(a, [(0, 0)] * (a.ndim - 1) + [(0, pad)])
    return a


def _pad_axis0(a, target):
    pad = target - a.shape[0]
    if pad:
        a = jnp.pad(a, [(0, pad)] + [(0, 0)] * (a.ndim - 1))
    return a


def fc_relu_reg_forward(inputs, params, *, single_buffer_weights=True,
                        use_bf16_matmul=False):
    """Forward pass of FC_Relu_REG.  inputs: (..., D) -> (..., R)."""
    w1_t, b1 = params["w1_t"], params["b1"]
    w2_t, b2 = params["w2_t"], params["b2"]
    w3_t, b3 = params["w3_t"], params["b3"]

    D = inputs.shape[-1]
    lead = inputs.shape[:-1]
    H, H2, R = w1_t.shape[1], w2_t.shape[1], w3_t.shape[1]

    # ---- lane padding (zeros -> padded lanes stay exactly 0 through ReLU) ----
    Hp, H2p, Rp = _round_up(H, _LANE), _round_up(H2, _LANE), _round_up(R, _LANE)
    w1p = _pad_last(w1_t.astype(jnp.float32), Hp)
    b1p = _pad_last(b1.astype(jnp.float32), Hp)
    w2p = _pad_last(_pad_axis0(w2_t.astype(jnp.float32), Hp), H2p)
    b2p = _pad_last(b2.astype(jnp.float32), H2p)
    w3p = _pad_last(_pad_axis0(w3_t.astype(jnp.float32), H2p), Rp)
    b3p = _pad_last(b3.astype(jnp.float32), Rp)

    x2d = inputs.reshape(-1, D).astype(jnp.float32)
    N = x2d.shape[0]

    mat_dtype = jnp.bfloat16 if use_bf16_matmul else jnp.float32
    if use_bf16_matmul:
        # bf16 operands, f32 MXU accumulation + f32 bias/ReLU epilogue.
        x2d, w1p, w2p, w3p = (a.astype(mat_dtype) for a in (x2d, w1p, w2p, w3p))

    # ---- row tiling: >=2 grid steps, minimal tail padding, spill-aware cap ----
    sub = 16 if use_bf16_matmul else 8
    cap = 512 if Hp <= 256 else (256 if Hp <= 1024 else 128)
    n_blocks = max(2, _cdiv(N, cap))
    bm = _round_up(_cdiv(N, n_blocks), sub)
    n_blocks = max(2, _cdiv(N, bm))
    Np = n_blocks * bm
    if Np != N:
        x2d = jnp.pad(x2d, ((0, Np - N), (0, 0)))

    # ---- VMEM budget + cost estimate ----
    itemsize = jnp.dtype(mat_dtype).itemsize
    weight_bytes = (itemsize * (D * Hp + Hp * H2p + H2p * Rp)
                    + 4 * (Hp + H2p + Rp))
    wbuf = 1 if single_buffer_weights else 2
    io_bytes = 2 * (itemsize * bm * D + 4 * bm * Rp)          # double-buffered I/O
    interm_bytes = 4 * bm * (Hp + H2p)                        # live h1/h2
    vmem_needed = wbuf * weight_bytes + io_bytes + 2 * interm_bytes
    vmem_limit = int(min(64 << 20, max(int(vmem_needed * 1.5) + (2 << 20),
                                       16 << 20)))
    cost = pl.CostEstimate(
        flops=2 * Np * (D * Hp + Hp * H2p + H2p * Rp),
        transcendentals=0,
        bytes_accessed=int(Np * D * itemsize + Np * Rp * 4 + weight_bytes))

    def _const_spec(shape):
        # Resident operands: constant index_map; single-buffer to halve their
        # VMEM footprint (matters on v7x's 64 MiB VMEM).
        if single_buffer_weights and hasattr(pl, "Buffered"):
            return pl.BlockSpec(shape, lambda i: (0, 0),
                                pipeline_mode=pl.Buffered(1))
        return pl.BlockSpec(shape, lambda i: (0, 0))

    out = pl.pallas_call(
        _fc_relu_reg_kernel,
        out_shape=jax.ShapeDtypeStruct((Np, Rp), jnp.float32),
        grid=(n_blocks,),
        in_specs=[
            pl.BlockSpec((bm, D), lambda i: (i, 0)),   # input rows (pipelined)
            _const_spec((D, Hp)),                      # W1^T
            _const_spec((1, Hp)),                      # b1
            _const_spec((Hp, H2p)),                    # W2^T
            _const_spec((1, H2p)),                     # b2
            _const_spec((H2p, Rp)),                    # W3^T
            _const_spec((1, Rp)),                      # b3
        ],
        out_specs=pl.BlockSpec((bm, Rp), lambda i: (i, 0)),   # lane-dense output
        compiler_params=pltpu.CompilerParams(
            dimension_semantics=("parallel",),         # independent row blocks
            vmem_limit_bytes=vmem_limit,
        ),
        cost_estimate=cost,
    )(x2d, w1p, b1p, w2p, b2p, w3p, b3p)

    return out[:N, :R].reshape(*lead, R)


# ----------------------------------------------------------------------------
# Deterministic parameter init (PyTorch nn.Linear-style uniform(-1/sqrt(fan_in)))
# ----------------------------------------------------------------------------
def init_params(key, feature_dim, hidden_dim, reg_dim):
    def linear_init(key, fan_in, fan_out):
        k = 1.0 / jnp.sqrt(fan_in)
        kw, kb = jax.random.split(key)
        w = jax.random.uniform(kw, (fan_out, fan_in), jnp.float32, -k, k)
        b = jax.random.uniform(kb, (fan_out,), jnp.float32, -k, k)
        return w.T, b[None, :]                         # transposed weight + 2-D bias

    k1, k2, k3 = jax.random.split(key, 3)
    w1_t, b1 = linear_init(k1, feature_dim, hidden_dim)
    w2_t, b2 = linear_init(k2, hidden_dim, 2 * hidden_dim)
    w3_t, b3 = linear_init(k3, 2 * hidden_dim, reg_dim)
    return {"w1_t": w1_t, "b1": b1,
            "w2_t": w2_t, "b2": b2,
            "w3_t": w3_t, "b3": b3}


# ----------------------------------------------------------------------------
# Pure-JAX reference (sanity check)
# ----------------------------------------------------------------------------
def _reference_forward(inputs, params):
    x = inputs.astype(jnp.float32)
    x = jnp.maximum(x @ params["w1_t"] + params["b1"], 0.0)
    x = jnp.maximum(x @ params["w2_t"] + params["b2"], 0.0)
    return x @ params["w3_t"] + params["b3"]


# ----------------------------------------------------------------------------
if __name__ == "__main__":
    feature_dim, hidden_dim, reg_dim = 8, 32, 4
    seq_len, batch = 8, 2

    key = jax.random.PRNGKey(0)
    key, pkey, xkey = jax.random.split(key, 3)
    params = init_params(pkey, feature_dim, hidden_dim, reg_dim)
    inputs = jax.random.normal(xkey, (seq_len, batch, feature_dim), jnp.float32)

    run = jax.jit(functools.partial(fc_relu_reg_forward, params=params))
    try:
        reg = jax.block_until_ready(run(inputs))
    except Exception:
        # Safety net: if this jax/Mosaic build rejects pipeline_mode=Buffered(1)
        # on resident operands, fall back to default double-buffering.
        run = jax.jit(functools.partial(fc_relu_reg_forward, params=params,
                                        single_buffer_weights=False))
        reg = jax.block_until_ready(run(inputs))

    ref = _reference_forward(inputs, params)
    assert reg.shape == (seq_len, batch, reg_dim)
    assert jnp.allclose(reg, ref, atol=1e-5, rtol=1e-5), float(
        jnp.max(jnp.abs(reg - ref))
    )

    print("KERNEL_OK")
</pallas_src>

<mosaic_0001>
module attributes {stable_mosaic.version = 11 : i64} {
  func.func @_fc_relu_reg_kernel(%arg0: i32, %arg1: memref<8x8xf32, #tpu.memory_space<vmem>>, %arg2: memref<8x128xf32, #tpu.memory_space<vmem>>, %arg3: memref<1x128xf32, #tpu.memory_space<vmem>>, %arg4: memref<128x128xf32, #tpu.memory_space<vmem>>, %arg5: memref<1x128xf32, #tpu.memory_space<vmem>>, %arg6: memref<128x128xf32, #tpu.memory_space<vmem>>, %arg7: memref<1x128xf32, #tpu.memory_space<vmem>>, %arg8: memref<8x128xf32, #tpu.memory_space<vmem>>) attributes {dimension_semantics = [#tpu.dimension_semantics<parallel>], iteration_bounds = array<i64: 2>, scalar_prefetch = 0 : i64, scratch_operands = 0 : i64, tpu.core_type = #tpu.core_type<tc>, window_params = [{transform_indices = @transform_0, window_bounds = array<i64: 8, 8>}, {pipeline_mode = #tpu.pipeline_mode<synchronous>, transform_indices = @transform_1, window_bounds = array<i64: 8, 128>}, {pipeline_mode = #tpu.pipeline_mode<synchronous>, transform_indices = @transform_2, window_bounds = array<i64: 1, 128>}, {pipeline_mode = #tpu.pipeline_mode<synchronous>, transform_indices = @transform_3, window_bounds = array<i64: 128, 128>}, {pipeline_mode = #tpu.pipeline_mode<synchronous>, transform_indices = @transform_4, window_bounds = array<i64: 1, 128>}, {pipeline_mode = #tpu.pipeline_mode<synchronous>, transform_indices = @transform_5, window_bounds = array<i64: 128, 128>}, {pipeline_mode = #tpu.pipeline_mode<synchronous>, transform_indices = @transform_6, window_bounds = array<i64: 1, 128>}, {transform_indices = @transform_7, window_bounds = array<i64: 8, 128>}]} {
    %c0 = arith.constant 0 : index
    %c0_0 = arith.constant 0 : index
    %0 = vector.load %arg1[%c0, %c0_0] : memref<8x8xf32, #tpu.memory_space<vmem>>, vector<8x8xf32>
    %c0_1 = arith.constant 0 : index
    %c0_2 = arith.constant 0 : index
    %1 = vector.load %arg2[%c0_1, %c0_2] : memref<8x128xf32, #tpu.memory_space<vmem>>, vector<8x128xf32>
    %cst = arith.constant dense<0.000000e+00> : vector<8x128xf32>
    %2 = tpu.matmul %0, %1, %cst {dimension_numbers = #tpu.dot_dimension_numbers<[1], [0], [0], [1], [0, 0, 1, 1], [], []>} : vector<8x8xf32>, vector<8x128xf32>, vector<8x128xf32> -> vector<8x128xf32>
    %c0_3 = arith.constant 0 : index
    %c0_4 = arith.constant 0 : index
    %3 = vector.load %arg3[%c0_3, %c0_4] : memref<1x128xf32, #tpu.memory_space<vmem>>, vector<1x128xf32>
    %4 = vector.broadcast %3 : vector<1x128xf32> to vector<8x128xf32>
    %5 = arith.addf %2, %4 : vector<8x128xf32>
    %cst_5 = arith.constant 0.000000e+00 : f32
    %6 = vector.broadcast %cst_5 : f32 to vector<8x128xf32>
    %7 = arith.maximumf %5, %6 : vector<8x128xf32>
    %c0_6 = arith.constant 0 : index
    %c0_7 = arith.constant 0 : index
    %8 = vector.load %arg4[%c0_6, %c0_7] : memref<128x128xf32, #tpu.memory_space<vmem>>, vector<128x128xf32>
    %cst_8 = arith.constant dense<0.000000e+00> : vector<8x128xf32>
    %9 = tpu.matmul %7, %8, %cst_8 {dimension_numbers = #tpu.dot_dimension_numbers<[1], [0], [0], [1], [0, 0, 1, 1], [], []>} : vector<8x128xf32>, vector<128x128xf32>, vector<8x128xf32> -> vector<8x128xf32>
    %c0_9 = arith.constant 0 : index
    %c0_10 = arith.constant 0 : index
    %10 = vector.load %arg5[%c0_9, %c0_10] : memref<1x128xf32, #tpu.memory_space<vmem>>, vector<1x128xf32>
    %11 = vector.broadcast %10 : vector<1x128xf32> to vector<8x128xf32>
    %12 = arith.addf %9, %11 : vector<8x128xf32>
    %cst_11 = arith.constant 0.000000e+00 : f32
    %13 = vector.broadcast %cst_11 : f32 to vector<8x128xf32>
    %14 = arith.maximumf %12, %13 : vector<8x128xf32>
    %c0_12 = arith.constant 0 : index
    %c0_13 = arith.constant 0 : index
    %15 = vector.load %arg6[%c0_12, %c0_13] : memref<128x128xf32, #tpu.memory_space<vmem>>, vector<128x128xf32>
    %cst_14 = arith.constant dense<0.000000e+00> : vector<8x128xf32>
    %16 = tpu.matmul %14, %15, %cst_14 {dimension_numbers = #tpu.dot_dimension_numbers<[1], [0], [0], [1], [0, 0, 1, 1], [], []>} : vector<8x128xf32>, vector<128x128xf32>, vector<8x128xf32> -> vector<8x128xf32>
    %c0_15 = arith.constant 0 : index
    %c0_16 = arith.constant 0 : index
    %17 = vector.load %arg7[%c0_15, %c0_16] : memref<1x128xf32, #tpu.memory_space<vmem>>, vector<1x128xf32>
    %18 = vector.broadcast %17 : vector<1x128xf32> to vector<8x128xf32>
    %19 = arith.addf %16, %18 : vector<8x128xf32>
    %c0_17 = arith.constant 0 : index
    %c0_18 = arith.constant 0 : index
    %20 = vector.load %arg8[%c0_17, %c0_18] : memref<8x128xf32, #tpu.memory_space<vmem>>, vector<8x128xf32>
    tpu.vector_store %arg8[%c0_17, %c0_18], %19 {strides = array<i32>} : memref<8x128xf32, #tpu.memory_space<vmem>>, vector<8x128xf32>,
    return
  }
  func.func @transform_0(%arg0: i32) -> (i32, i32) {
    %c0_i32 = arith.constant 0 : i32
    %c0_i32_0 = arith.constant 0 : i32
    return %arg0, %c0_i32 : i32, i32
  }
  func.func @transform_1(%arg0: i32) -> (i32, i32) {
    %c0_i32 = arith.constant 0 : i32
    %c0_i32_0 = arith.constant 0 : i32
    %c0_i32_1 = arith.constant 0 : i32
    return %c0_i32, %c0_i32_0 : i32, i32
  }
  func.func @transform_2(%arg0: i32) -> (i32, i32) {
    %c0_i32 = arith.constant 0 : i32
    %c0_i32_0 = arith.constant 0 : i32
    %c0_i32_1 = arith.constant 0 : i32
    return %c0_i32, %c0_i32_0 : i32, i32
  }
  func.func @transform_3(%arg0: i32) -> (i32, i32) {
    %c0_i32 = arith.constant 0 : i32
    %c0_i32_0 = arith.constant 0 : i32
    %c0_i32_1 = arith.constant 0 : i32
    return %c0_i32, %c0_i32_0 : i32, i32
  }
  func.func @transform_4(%arg0: i32) -> (i32, i32) {
    %c0_i32 = arith.constant 0 : i32
    %c0_i32_0 = arith.constant 0 : i32
    %c0_i32_1 = arith.constant 0 : i32
    return %c0_i32, %c0_i32_0 : i32, i32
  }
  func.func @transform_5(%arg0: i32) -> (i32, i32) {
    %c0_i32 = arith.constant 0 : i32
    %c0_i32_0 = arith.constant 0 : i32
    %c0_i32_1 = arith.constant 0 : i32
    return %c0_i32, %c0_i32_0 : i32, i32
  }
  func.func @transform_6(%arg0: i32) -> (i32, i32) {
    %c0_i32 = arith.constant 0 : i32
    %c0_i32_0 = arith.constant 0 : i32
    %c0_i32_1 = arith.constant 0 : i32
    return %c0_i32, %c0_i32_0 : i32, i32
  }
  func.func @transform_7(%arg0: i32) -> (i32, i32) {
    %c0_i32 = arith.constant 0 : i32
    %c0_i32_0 = arith.constant 0 : i32
    return %arg0, %c0_i32 : i32, i32
  }
}

module attributes {stable_mosaic.version = 11 : i64} {
  func.func @_fc_relu_reg_kernel(%arg0: i32, %arg1: memref<8x8xf32, #tpu.memory_space<vmem>>, %arg2: memref<8x128xf32, #tpu.memory_space<vmem>>, %arg3: memref<1x128xf32, #tpu.memory_space<vmem>>, %arg4: memref<128x128xf32, #tpu.memory_space<vmem>>, %arg5: memref<1x128xf32, #tpu.memory_space<vmem>>, %arg6: memref<128x128xf32, #tpu.memory_space<vmem>>, %arg7: memref<1x128xf32, #tpu.memory_space<vmem>>, %arg8: memref<8x128xf32, #tpu.memory_space<vmem>>) attributes {dimension_semantics = [#tpu.dimension_semantics<parallel>], iteration_bounds = array<i64: 2>, scalar_prefetch = 0 : i64, scratch_operands = 0 : i64, tpu.core_type = #tpu.core_type<tc>, window_params = [{transform_indices = @transform_0, window_bounds = array<i64: 8, 8>}, {pipeline_mode = #tpu.pipeline_mode<synchronous>, transform_indices = @transform_1, window_bounds = array<i64: 8, 128>}, {pipeline_mode = #tpu.pipeline_mode<synchronous>, transform_indices = @transform_2, window_bounds = array<i64: 1, 128>}, {pipeline_mode = #tpu.pipeline_mode<synchronous>, transform_indices = @transform_3, window_bounds = array<i64: 128, 128>}, {pipeline_mode = #tpu.pipeline_mode<synchronous>, transform_indices = @transform_4, window_bounds = array<i64: 1, 128>}, {pipeline_mode = #tpu.pipeline_mode<synchronous>, transform_indices = @transform_5, window_bounds = array<i64: 128, 128>}, {pipeline_mode = #tpu.pipeline_mode<synchronous>, transform_indices = @transform_6, window_bounds = array<i64: 1, 128>}, {transform_indices = @transform_7, window_bounds = array<i64: 8, 128>}]} {
    %c0 = arith.constant 0 : index
    %c0_0 = arith.constant 0 : index
    %0 = vector.load %arg1[%c0, %c0_0] : memref<8x8xf32, #tpu.memory_space<vmem>>, vector<8x8xf32>
    %c0_1 = arith.constant 0 : index
    %c0_2 = arith.constant 0 : index
    %1 = vector.load %arg2[%c0_1, %c0_2] : memref<8x128xf32, #tpu.memory_space<vmem>>, vector<8x128xf32>
    %cst = arith.constant dense<0.000000e+00> : vector<8x128xf32>
    %2 = tpu.matmul %0, %1, %cst {dimension_numbers = #tpu.dot_dimension_numbers<[1], [0], [0], [1], [0, 0, 1, 1], [], []>} : vector<8x8xf32>, vector<8x128xf32>, vector<8x128xf32> -> vector<8x128xf32>
    %c0_3 = arith.constant 0 : index
    %c0_4 = arith.constant 0 : index
    %3 = vector.load %arg3[%c0_3, %c0_4] : memref<1x128xf32, #tpu.memory_space<vmem>>, vector<1x128xf32>
    %4 = vector.broadcast %3 : vector<1x128xf32> to vector<8x128xf32>
    %5 = arith.addf %2, %4 : vector<8x128xf32>
    %cst_5 = arith.constant 0.000000e+00 : f32
    %6 = vector.broadcast %cst_5 : f32 to vector<8x128xf32>
    %7 = arith.maximumf %5, %6 : vector<8x128xf32>
    %c0_6 = arith.constant 0 : index
    %c0_7 = arith.constant 0 : index
    %8 = vector.load %arg4[%c0_6, %c0_7] : memref<128x128xf32, #tpu.memory_space<vmem>>, vector<128x128xf32>
    %cst_8 = arith.constant dense<0.000000e+00> : vector<8x128xf32>
    %9 = tpu.matmul %7, %8, %cst_8 {dimension_numbers = #tpu.dot_dimension_numbers<[1], [0], [0], [1], [0, 0, 1, 1], [], []>} : vector<8x128xf32>, vector<128x128xf32>, vector<8x128xf32> -> vector<8x128xf32>
    %c0_9 = arith.constant 0 : index
    %c0_10 = arith.constant 0 : index
    %10 = vector.load %arg5[%c0_9, %c0_10] : memref<1x128xf32, #tpu.memory_space<vmem>>, vector<1x128xf32>
    %11 = vector.broadcast %10 : vector<1x128xf32> to vector<8x128xf32>
    %12 = arith.addf %9, %11 : vector<8x128xf32>
    %cst_11 = arith.constant 0.000000e+00 : f32
    %13 = vector.broadcast %cst_11 : f32 to vector<8x128xf32>
    %14 = arith.maximumf %12, %13 : vector<8x128xf32>
    %c0_12 = arith.constant 0 : index
    %c0_13 = arith.constant 0 : index
    %15 = vector.load %arg6[%c0_12, %c0_13] : memref<128x128xf32, #tpu.memory_space<vmem>>, vector<128x128xf32>
    %cst_14 = arith.constant dense<0.000000e+00> : vector<8x128xf32>
    %16 = tpu.matmul %14, %15, %cst_14 {dimension_numbers = #tpu.dot_dimension_numbers<[1], [0], [0], [1], [0, 0, 1, 1], [], []>} : vector<8x128xf32>, vector<128x128xf32>, vector<8x128xf32> -> vector<8x128xf32>
    %c0_15 = arith.constant 0 : index
    %c0_16 = arith.constant 0 : index
    %17 = vector.load %arg7[%c0_15, %c0_16] : memref<1x128xf32, #tpu.memory_space<vmem>>, vector<1x128xf32>
    %18 = vector.broadcast %17 : vector<1x128xf32> to vector<8x128xf32>
    %19 = arith.addf %16, %18 : vector<8x128xf32>
    %c0_17 = arith.constant 0 : index
    %c0_18 = arith.constant 0 : index
    %20 = vector.load %arg8[%c0_17, %c0_18] : memref<8x128xf32, #tpu.memory_space<vmem>>, vector<8x128xf32>
    tpu.vector_store %arg8[%c0_17, %c0_18], %19 {strides = array<i32>} : memref<8x128xf32, #tpu.memory_space<vmem>>, vector<8x128xf32>,
    return
  }
  func.func @transform_0(%arg0: i32) -> (i32, i32) {
    %c0_i32 = arith.constant 0 : i32
    %c0_i32_0 = arith.constant 0 : i32
    return %arg0, %c0_i32 : i32, i32
  }
  func.func @transform_1(%arg0: i32) -> (i32, i32) {
    %c0_i32 = arith.constant 0 : i32
    %c0_i32_0 = arith.constant 0 : i32
    %c0_i32_1 = arith.constant 0 : i32
    return %c0_i32, %c0_i32_0 : i32, i32
  }
  func.func @transform_2(%arg0: i32) -> (i32, i32) {
    %c0_i32 = arith.constant 0 : i32
    %c0_i32_0 = arith.constant 0 : i32
    %c0_i32_1 = arith.constant 0 : i32
    return %c0_i32, %c0_i32_0 : i32, i32
  }
  func.func @transform_3(%arg0: i32) -> (i32, i32) {
    %c0_i32 = arith.constant 0 : i32
    %c0_i32_0 = arith.constant 0 : i32
    %c0_i32_1 = arith.constant 0 : i32
    return %c0_i32, %c0_i32_0 : i32, i32
  }
  func.func @transform_4(%arg0: i32) -> (i32, i32) {
    %c0_i32 = arith.constant 0 : i32
    %c0_i32_0 = arith.constant 0 : i32
    %c0_i32_1 = arith.constant 0 : i32
    return %c0_i32, %c0_i32_0 : i32, i32
  }
  func.func @transform_5(%arg0: i32) -> (i32, i32) {
    %c0_i32 = arith.constant 0 : i32
    %c0_i32_0 = arith.constant 0 : i32
    %c0_i32_1 = arith.constant 0 : i32
    return %c0_i32, %c0_i32_0 : i32, i32
  }
  func.func @transform_6(%arg0: i32) -> (i32, i32) {
    %c0_i32 = arith.constant 0 : i32
    %c0_i32_0 = arith.constant 0 : i32
    %c0_i32_1 = arith.constant 0 : i32
    return %c0_i32, %c0_i32_0 : i32, i32
  }
  func.func @transform_7(%arg0: i32) -> (i32, i32) {
    %c0_i32 = arith.constant 0 : i32
    %c0_i32_0 = arith.constant 0 : i32
    return %arg0, %c0_i32 : i32, i32
  }
}

</mosaic_0001>

<bundles_post_ra>
// kernel: fc_relu_reg_forward.1
= control target key start
LH: loop header
LB: loop body
LE: loop exit
PB: predicated region body
PF: predicated region fallthrough
CT: control target
= control target key end

     0   :  { %12 = vsyncpa [#allocation3], 0  ;;  %s1388_s0 = inlined_call_operand.hbm [shape: f32[16,8], index: 0, kind: input, shape index: {}]   ;;  %s1389_s1 = inlined_call_operand.hbm [shape: f32[8,128], index: 1, kind: input, shape index: {}]   ;;  %s1390_s2 = inlined_call_operand.vmem [shape: f32[1,128], index: 2, kind: input, shape index: {}]   ;;  %s1391_s3 = inlined_call_operand.hbm [shape: f32[128,128], index: 3, kind: input, shape index: {}]   ;;  %s1392_s4 = inlined_call_operand.vmem [shape: f32[1,128], index: 4, kind: input, shape index: {}]   ;;  %s1393_s5 = inlined_call_operand.hbm [shape: f32[128,128], index: 5, kind: input, shape index: {}]   ;;  %s1394_s6 = inlined_call_operand.vmem [shape: f32[1,128], index: 6, kind: input, shape index: {}]   ;;  %s1395_s7 = inlined_call_operand.vmem [shape: f32[16,128], index: 7, kind: output, shape index: {}]  }
   0x1   :  { %14 = vsyncpa [#allocation3 + $0x1], 0 }
   0x2   :  { %15 = vsyncpa [#allocation5], 0 }
   0x3   :  { %16 = vsyncpa [#allocation8], 0  ;;  %s1163_s24 = smov 0   ;;  %s1165_s25 = smov 0  }
   0x4   :  { %s1167_s26 = smov 0   ;;  %s1169_s27 = smov 0  }
   0x5 LB: > { %s1182_s28 = sadd.s32 4294967295, %s1112_s27   ;;  %p42_p0 = scmp.ne.s32.totalorder %s1104_s25, %s1100_s24  ;;  %s1112_s27 = sphi %s1169_s27, %s1413_s27   ;;  %s1108_s26 = sphi %s1167_s26, %s1412_s26   ;;  %s1104_s25 = sphi %s1165_s25, %s1411_s25   ;;  %s1100_s24 = sphi %s1163_s24, %s1410_s24  }
   0x6   : > { %p1396_p1 = scmp.eq.s32.totalorder %s1182_s28, 0  ;;  %p703_p2 = scmp.ge.s32.totalorder %s1112_s27, 1 }
   0x7   : > { %p205_p3 = scmp.lt.s32.totalorder %s1112_s27, 3  ;;  %s1114_s8 = smov [#allocation4]  }
   0x8   : > { %p1190_p4 = por %p1396_p1, %p42_p0  ;;  %s218_s9 = sshll.u32 %s1114_s8, 4  ;;  %s219_s9 = int_to_ptr.vmem [resolvable:$true] %s218_s9 }
   0x9   : > { %p1194_p5 = pnand %p703_p2, %p205_p3  ;;  %s1115_s10 = smov [#allocation6]  }
   0xa   : > { %s1399_s29 = scalar_select %p1190_p4, 1, 0 }
   0xb   : > { %s1400_s30 = scalar_select %p1194_p5, 1, 0 }
   0xc   : > { %p895_p6 = pneg %p1194_p5  ;;  %s231_s11 = sshll.u32 %s1115_s10, 4  ;;  %s1206_s11 = int_to_ptr.vmem [resolvable:$true] %s231_s11 }
   0xd   : > { %s1116_s13 = smov [#allocation7]   ;;  %s956_s17 = scalar_lea.hbm %s1389_s1, 128 }
   0xe   : > { %p1202_p7 = pnand %p895_p6, %p1396_p1  ;;  %s1208_s14 = sshll.u32 %s1116_s13, 4  ;;  %s248_s14 = int_to_ptr.vmem [resolvable:$true] %s1208_s14 }
   0xf   : > { %p957_p8 = scmp.ne.s32.totalorder %s1389_s1, %s956_s17  ;;  %p963_p12 = scmp.lt.u32.totalorder %s956_s17, %s1389_s1 }
  0x10   : > { %p1218_p9 = pneg %p1202_p7 }
  0x12   : > { %p959_p10 = pnand %p1218_p9, %p957_p8 }
  0x14   : > { %p960_p11 = pneg %p959_p10 }
  0x16   : > { %p965_p13 = pnand %p963_p12, %p960_p11 }
  0x18   : > { %968 = shalt.err (!%p965_p13)
}
  0x19   : > { %s969_s23 = scalar_lea.vmem %s219_s9, 128  ;;  %p977_p6 = scmp.lt.s32.totalorder %s219_s9, %s219_s9 }
  0x1a   : > { %p970_p0 = scmp.ne.s32.totalorder %s219_s9, %s969_s23  ;;  %p978_p1 = scmp.lt.s32.totalorder %s969_s23, %s969_s23 }
  0x1c   : > { %p972_p2 = pnand %p970_p0, %p1218_p9  ;;  %p979_p4 = por %p978_p1, %p977_p6 }
  0x1e   : > { %p973_p3 = pneg %p972_p2 }
  0x20   : > { %p980_p5 = pnand %p979_p4, %p973_p3 }
  0x22   : > { %983 = shalt.err (!%p980_p5)
}
  0x23   : > { %898 = dma.hbm_to_vmem [thread:$0]  (!%p1202_p7), %s1389_s1, 128, %s219_s9, [#allocation5]  }
  0x24   : > { %s984_s15 = scalar_lea.hbm %s1391_s3, 2048 }
  0x25   : > { %p985_p8 = scmp.ne.s32.totalorder %s1391_s3, %s984_s15  ;;  %p991_p4 = scmp.lt.u32.totalorder %s984_s15, %s1391_s3 }
  0x27   : > { %p987_p10 = pnand %p985_p8, %p1218_p9 }
  0x29   : > { %p988_p1 = pneg %p987_p10 }
  0x2b   : > { %p993_p5 = pnand %p991_p4, %p988_p1 }
  0x2d   : > { %996 = shalt.err (!%p993_p5)
}
  0x2e   : > { %s997_s9 = scalar_lea.vmem %s1206_s11, 2048  ;;  %p1005_p0 = scmp.lt.s32.totalorder %s1206_s11, %s1206_s11 }
  0x2f   : > { %p998_p11 = scmp.ne.s32.totalorder %s1206_s11, %s997_s9  ;;  %p1006_p2 = scmp.lt.s32.totalorder %s997_s9, %s997_s9 }
  0x31   : > { %p1000_p12 = pnand %p998_p11, %p1218_p9  ;;  %p1007_p3 = por %p1006_p2, %p1005_p0 }
  0x33   : > { %p1001_p13 = pneg %p1000_p12 }
  0x35   : > { %p1008_p6 = pnand %p1007_p3, %p1001_p13 }
  0x37   : > { %1011 = shalt.err (!%p1008_p6)
}
  0x38   : > { %s1117_s21 = smov 128   ;;  %s1118_s22 = smov 8  }
  0x39   : > { %901 = dma.hbm_to_vmem [thread:$0]  (!%p1202_p7), %s1391_s3, 2048, %s1206_s11, [#allocation5], %s1117_s21, %s1117_s21, %s1118_s22  }
  0x3a   : > { %s1012_s13 = scalar_lea.hbm %s1393_s5, 2048 }
  0x3b   : > { %p1013_p8 = scmp.ne.s32.totalorder %s1393_s5, %s1012_s13  ;;  %p1019_p4 = scmp.lt.u32.totalorder %s1012_s13, %s1393_s5 }
  0x3d   : > { %p1015_p10 = pnand %p1013_p8, %p1218_p9 }
  0x3f   : > { %p1016_p1 = pneg %p1015_p10 }
  0x41   : > { %p1021_p5 = pnand %p1019_p4, %p1016_p1 }
  0x43   : > { %1024 = shalt.err (!%p1021_p5)
}
  0x44   : > { %s1025_s19 = scalar_lea.vmem %s248_s14, 2048  ;;  %p1033_p0 = scmp.lt.s32.totalorder %s248_s14, %s248_s14 }
  0x45   : > { %p1026_p11 = scmp.ne.s32.totalorder %s248_s14, %s1025_s19  ;;  %p1034_p2 = scmp.lt.s32.totalorder %s1025_s19, %s1025_s19 }
  0x47   : > { %p1028_p12 = pnand %p1026_p11, %p1218_p9  ;;  %p1035_p3 = por %p1034_p2, %p1033_p0 }
  0x49   : > { %p1029_p13 = pneg %p1028_p12 }
  0x4b   : > { %p1036_p6 = pnand %p1035_p3, %p1029_p13 }
  0x4d   : > { %1039 = shalt.err (!%p1036_p6)
}
  0x4e   : > { %904 = dma.hbm_to_vmem [thread:$0]  (!%p1202_p7), %s1393_s5, 2048, %s248_s14, [#allocation8], %s1117_s21, %s1117_s21, %s1118_s22  }
  0x4f   : > { %s1277_s20 = sadd.s32 1, %s1112_s27   ;;  %s29_s24 = sadd.s32 1, %s1108_s26 }
  0x50   : > { %s26_s23 = ssub.s32 %s1112_s27, %s1277_s20  ;;  %p36_p8 = scmp.ne.s32.totalorder %s1108_s26, %s1104_s25 }
  0x51   : > { %p27_p9 = scmp.eq.s32.totalorder %s26_s23, 0  ;;  %p37_p10 = scmp.eq.s32.totalorder %s1112_s27, 0 }
  0x52   : > { %p912_p1 = scmp.lt.s32.totalorder %s1112_s27, 2  ;;  %s264_s8 = sand.u32 1, %s1108_s26  }
  0x53   : > { %s1287_s12 = scalar_select %p27_p9, %s1108_s26, %s29_s24  }
  0x54   : > { %p38_p4 = por %p37_p10, %p36_p8  ;;  %s708_s10 = sshll.u32 %s264_s8, 3 }
  0x55   : > { %s709_s13 = sshll.u32 %s1112_s27, 7  ;;  %s268_s14 = scalar_lea.vmem [#allocation2], %s708_s10 }
  0x56   : > { %s1294_s17 = scalar_lea.hbm %s1388_s0, %s709_s13  ;;  %s275_s21 = sshll.u32 %s268_s14, 4  ;;  %s1296_s21 = int_to_ptr.vmem [resolvable:$true] %s275_s21 }
  0x57   : > { %p1298_p7 = pnand %p912_p1, %p38_p4  ;;  %s265_s27 = scalar_lea.sflag [#allocation3], %s264_s8 }
  0x58   : > { %s1040_s18 = scalar_lea.hbm %s1294_s17, 128  ;;  %s1045_s9 = scalar_lea.hbm %s1388_s0, 256 }
  0x59   : > { %p1041_p5 = scmp.ne.s32.totalorder %s1294_s17, %s1040_s18  ;;  %p1042_p11 = pneg %p1298_p7 }
  0x5a   : > { %p1046_p0 = scmp.lt.u32.totalorder %s1294_s17, %s1388_s0  ;;  %p1047_p2 = scmp.lt.u32.totalorder %s1045_s9, %s1040_s18 }
  0x5b   : > { %p1043_p12 = pnand %p1042_p11, %p1041_p5  ;;  %p1049_p6 = scmp.lt.u32.totalorder %s1040_s18, %s1294_s17 }
  0x5c   : > { %p1048_p3 = por %p1047_p2, %p1046_p0 }
  0x5d   : > { %p1044_p13 = pneg %p1043_p12 }
  0x5e   : > { %p1050_p9 = por %p1049_p6, %p1048_p3 }
  0x60   : > { %p1051_p8 = pnand %p1050_p9, %p1044_p13 }
  0x62   : > { %1054 = shalt.err (!%p1051_p8)
}
  0x63   : > { %s1055_s8 = scalar_lea.vmem %s1296_s21, 128  ;;  %s1119_s10 = smov [#allocation2]  }
  0x64   : > { %p1056_p10 = scmp.ne.s32.totalorder %s1296_s21, %s1055_s8  ;;  %s1060_s13 = sshll.u32 %s1119_s10, 4  ;;  %s1061_s13 = int_to_ptr.vmem [resolvable:$false] %s1060_s13 }
  0x65   : > { %s1062_s15 = scalar_lea.vmem %s1061_s13, 256  ;;  %p1063_p5 = scmp.lt.s32.totalorder %s1296_s21, %s1061_s13 }
  0x66   : > { %p1058_p1 = pnand %p1056_p10, %p1042_p11  ;;  %p1064_p12 = scmp.lt.s32.totalorder %s1062_s15, %s1055_s8 }
  0x68   : > { %p1059_p4 = pneg %p1058_p1  ;;  %p1065_p0 = por %p1064_p12, %p1063_p5 }
  0x6a   : > { %p1066_p2 = pnand %p1065_p0, %p1059_p4 }
  0x6c   : > { %1069 = shalt.err (!%p1066_p2)
}
  0x6d   : > { %908 = dma.hbm_to_vmem [thread:$0]  (!%p1298_p7), %s1294_s17, 128, %s1296_s21, %s265_s27  }
  0x6e   : > { %p1404_p13 = scmp.ne.s32.totalorder %s1400_s30, 0 }
  0x6f   : > { %s286_s16 = sand.u32 (!%p1404_p13), 1, %s1104_s25   ;;  %p1405_p11 = scmp.ne.s32.totalorder (!%p1404_p13), %s1399_s29, 0 }
  0x70   : > { %284 = sbr.rel (%p1404_p13) target bundleno = 777 (0x309), region = 48  ;;  %s711_s14 = sshll.u32 (!%p1404_p13), %s286_s16, 3 }
  0x71   : > { %s287_s18 = scalar_lea.sflag (!%p1404_p13), [#allocation3], %s286_s16  ;;  %s290_s19 = scalar_lea.vmem (!%p1404_p13), [#allocation2], %s711_s14 }
  0x77   : > { %1087 = dma.done.wait (%p1405_p11), %s287_s18, 128  }
  0x78   : > { %1089 = vsyncadd (%p1405_p11), %s287_s18, 4294967168  ;;  %p1406_p3 = scmp.eq.s32.totalorder %s1182_s28, 0 }
  0x7a   : > { %1091 = dma.done.wait (%p1406_p3), [#allocation5], 2176   ;;  %p1407_p6 = pmov %p1406_p3 }
  0x7b   : > { %p1408_p7 = pmov %p1406_p3 }
  0x7c   : > { %1093 = vsyncadd (%p1407_p6), [#allocation5], 4294965120 }
  0x7d   : > { %1095 = dma.done.wait (%p1408_p7), [#allocation8], 2048   ;;  %p1409_p9 = pmov %p1406_p3 }
  0x7e   : > { %v1120_v0 = vmov 0.0   ;;  %vm1121_vm0 = vmmov 0   ;;  %v1122_v1 = vmov 0.0|0.0   ;;  %vm345_vm1 = vcmask 64512   ;;  %v337_v2 = vld [vmem:[#allocation4] sm:$0xff]  ;;  %v336_v3 = vld [vmem:[%s290_s19] sm:$0xff] }
  0x7f   : > { %1097 = vsyncadd (%p1409_p9), [#allocation8], 4294965248  ;;  %758 = vmatprep.subr.mxu0 %v1120_v0  ;;  %760 = vmatprep.mubr.msk.f32.mxu0 %vm1121_vm0, %v1120_v0  ;;  %v420_v4 = vld [vmem:[#allocation6] sm:$0xff]  ;;  %v421_v5 = vld [vmem:[#allocation6 + $0x8] sm:$0xff]  ;;  %p332_p8 = scmp.lt.s32.totalorder %s1182_s28, 1 }
  0x80   : > { %833 = vmatprep.subr.bf16.mxu1 %v1122_v1  ;;  %795 = vmatprep.mubr.msk.f32.mxu1 %vm1121_vm0, %v1120_v0  ;;  %v422_v6 = vld [vmem:[#allocation6 + $0x10] sm:$0xff]  ;;  %v423_v7 = vld [vmem:[#allocation6 + $0x18] sm:$0xff]  ;;  %v834_v8 = vpack.c.bf16 %v421_v5, %v420_v4  ;;  %v424_v10 = vld [vmem:[#allocation6 + $0x20] sm:$0xff] }
  0x81   : > { %759 = vmatpush3.msra.mxu0 %v337_v2  ;;  %v837_v9 = vpack.c.bf16 %v423_v7, %v422_v6  ;;  %v425_v11 = vld [vmem:[#allocation6 + $0x28] sm:$0xff]  ;;  %v426_v13 = vld [vmem:[#allocation6 + $0x30] sm:$0xff]  ;;  %v427_v14 = vld [vmem:[#allocation6 + $0x38] sm:$0xff]  ;;  %s1415_s28 = smov (!%p332_p8, %s1182_s28), 1 }
  0x82   : > { %761 = vmatmul.mubr.msk.f32.vlgmr.msra.gmra.mrb[0].mxu0 %vm345_vm1, %v336_v3  ;;  %857 = vmatprep.subr.bf16.mxu0 %v1122_v1  ;;  %v840_v12 = vpack.c.bf16 %v425_v11, %v424_v10  ;;  %v843_v15 = vpack.c.bf16 %v427_v14, %v426_v13  ;;  %v428_v16 = vld [vmem:[#allocation6 + $0x40] sm:$0xff]  ;;  %v429_v17 = vld [vmem:[#allocation6 + $0x48] sm:$0xff]  ;;  %v430_v19 = vld [vmem:[#allocation6 + $0x50] sm:$0xff]  ;;  %s715_s22 = sshll.u32 %s1415_s28, 3 }
  0x83   : > { %830 = vmatprep.mubr.msk.f32.mxu0 %vm1121_vm0, %v1120_v0  ;;  %835 = vmatpush3.bf16.msra.mxu1 %v834_v8  ;;  %v846_v18 = vpack.c.bf16 %v429_v17, %v428_v16  ;;  %v431_v20 = vld [vmem:[#allocation6 + $0x58] sm:$0xff]  ;;  %v432_v22 = vld [vmem:[#allocation6 + $0x60] sm:$0xff]  ;;  %v433_v23 = vld [vmem:[#allocation6 + $0x68] sm:$0xff]  ;;  %s335_s24 = scalar_lea.vmem %s1395_s7, %s715_s22 }
  0x84   : > { %836 = vmatprep.subr.bf16.mxu1 %v1122_v1  ;;  %v849_v21 = vpack.c.bf16 %v431_v20, %v430_v19  ;;  %v852_v24 = vpack.c.bf16 %v433_v23, %v432_v22  ;;  %v434_v25 = vld [vmem:[#allocation6 + $0x70] sm:$0xff]  ;;  %v435_v26 = vld [vmem:[#allocation6 + $0x78] sm:$0xff]  ;;  %v514_v28 = vld [vmem:[#allocation7] sm:$0xff] }
  0x85   : > { %v855_v27 = vpack.c.bf16 %v435_v26, %v434_v25  ;;  %v515_v29 = vld [vmem:[#allocation7 + $0x8] sm:$0xff]  ;;  %v516_v30 = vld [vmem:[#allocation7 + $0x10] sm:$0xff]  ;;  %v517_v32 = vld [vmem:[#allocation7 + $0x18] sm:$0xff] }
  0x86   : > { %v858_v31 = vpack.c.bf16 %v515_v29, %v514_v28  ;;  %v861_v33 = vpack.c.bf16 %v517_v32, %v516_v30  ;;  %v518_v34 = vld [vmem:[#allocation7 + $0x20] sm:$0xff]  ;;  %v519_v35 = vld [vmem:[#allocation7 + $0x28] sm:$0xff]  ;;  %v520_v37 = vld [vmem:[#allocation7 + $0x30] sm:$0xff] }
  0x87   : > { %838 = vmatpush3.bf16.msra.mxu1 %v837_v9  ;;  %v864_v36 = vpack.c.bf16 %v519_v35, %v518_v34  ;;  %v521_v38 = vld [vmem:[#allocation7 + $0x38] sm:$0xff]  ;;  %v522_v40 = vld [vmem:[#allocation7 + $0x40] sm:$0xff]  ;;  %v523_v41 = vld [vmem:[#allocation7 + $0x48] sm:$0xff] }
  0x88   : > { %839 = vmatprep.subr.bf16.mxu1 %v1122_v1  ;;  %859 = vmatpush3.bf16.msra.mxu0 %v858_v31  ;;  %v867_v39 = vpack.c.bf16 %v521_v38, %v520_v37  ;;  %v870_v42 = vpack.c.bf16 %v523_v41, %v522_v40  ;;  %v524_v43 = vld [vmem:[#allocation7 + $0x50] sm:$0xff]  ;;  %v525_v44 = vld [vmem:[#allocation7 + $0x58] sm:$0xff]  ;;  %v526_v46 = vld [vmem:[#allocation7 + $0x60] sm:$0xff] }
  0x89   : > { %860 = vmatprep.subr.bf16.mxu0 %v1122_v1  ;;  %v873_v45 = vpack.c.bf16 %v525_v44, %v524_v43  ;;  %v527_v47 = vld [vmem:[#allocation7 + $0x68] sm:$0xff]  ;;  %v528_v54 = vld [vmem:[#allocation7 + $0x70] sm:$0xff]  ;;  %v529_v55 = vld [vmem:[#allocation7 + $0x78] sm:$0xff] }
  0x8a   : > { %v876_v48 = vpack.c.bf16 %v527_v47, %v526_v46  ;;  %v716_v49 = vld [vmem:[%s1390_s2] ss:$0 sm:$0xff]  ;;  %v879_v56 = vpack.c.bf16 %v529_v55, %v528_v54 }
  0x8b   : > { %841 = vmatpush3.bf16.msra.mxu1 %v840_v12  ;;  %v718_v57 = vld [vmem:[%s1392_s4] ss:$0 sm:$0xff] }
  0x8c   : > { %842 = vmatprep.subr.bf16.mxu1 %v1122_v1  ;;  %862 = vmatpush3.bf16.msra.mxu0 %v861_v33  ;;  %v719_v62 = vld [vmem:[%s1394_s6] ss:$0 sm:$0xff] }
  0x8d   : > { %863 = vmatprep.subr.bf16.mxu0 %v1122_v1 }
  0x8f   : > { %844 = vmatpush3.bf16.msra.mxu1 %v843_v15 }
  0x90   : > { %845 = vmatprep.subr.bf16.mxu1 %v1122_v1  ;;  %865 = vmatpush3.bf16.msra.mxu0 %v864_v36 }
  0x91   : > { %866 = vmatprep.subr.bf16.mxu0 %v1122_v1 }
  0x93   : > { %847 = vmatpush3.bf16.msra.mxu1 %v846_v18 }
  0x94   : > { %848 = vmatprep.subr.bf16.mxu1 %v1122_v1  ;;  %868 = vmatpush3.bf16.msra.mxu0 %v867_v39 }
  0x95   : > { %869 = vmatprep.subr.bf16.mxu0 %v1122_v1 }
  0x97   : > { %850 = vmatpush3.bf16.msra.mxu1 %v849_v21 }
  0x98   : > { %851 = vmatprep.subr.bf16.mxu1 %v1122_v1  ;;  %871 = vmatpush3.bf16.msra.mxu0 %v870_v42 }
  0x99   : > { %872 = vmatprep.subr.bf16.mxu0 %v1122_v1 }
  0x9b   : > { %853 = vmatpush3.bf16.msra.mxu1 %v852_v24 }
  0x9c   : > { %854 = vmatprep.subr.bf16.mxu1 %v1122_v1  ;;  %874 = vmatpush3.bf16.msra.mxu0 %v873_v45 }
  0x9d   : > { %875 = vmatprep.subr.bf16.mxu0 %v1122_v1 }
  0x9f   : > { %856 = vmatpush3.bf16.msra.mxu1 %v855_v27 }
  0xa0   : > { %877 = vmatpush3.bf16.msra.mxu0 %v876_v48 }
  0xa1   : > { %878 = vmatprep.subr.bf16.mxu0 %v1122_v1 }
  0xa4   : > { %880 = vmatpush3.bf16.msra.mxu0 %v879_v56 }
 0x155   : > { %v415_v50 = vpop.f32.mrb[0].mxu0 }
 0x156   : > { %v416_v51 = vadd.f32 %v716_v49, %v415_v50  ;;  %v762_v52 = vpop.f32.mrb[1].mxu0 }
 0x158   : > { %v419_v53 = vmax.f32 %v416_v51, 0.0 }
 0x15a   : > { %796 = vmatmul.mubr.f32.vlgmr.msra.gmra.mrb[0].mxu1 %v419_v53 }
 0x22d   : > { %v509_v58 = vpop.f32.mrb[0].mxu1 }
 0x22e   : > { %v510_v59 = vadd.f32 %v718_v57, %v509_v58  ;;  %v797_v60 = vpop.f32.mrb[1].mxu1 }
 0x230   : > { %v513_v61 = vmax.f32 %v510_v59, 0.0 }
 0x232   : > { %831 = vmatmul.mubr.f32.vlgmr.msra.gmra.mrb[2].mxu0 %v513_v61 }
 0x305   : > { %v603_v63 = vpop.f32.mrb[2].mxu0 }
 0x306   : > { %v604_v0 = vadd.f32 %v719_v62, %v603_v63  ;;  %v832_v1 = vpop.f32.mrb[3].mxu0 }
 0x308   : > { %607 = vst [vmem:[%s335_s24] sm:$0xff] %v604_v0 }
 0x309 PF: > { %p19_p10 = scmp.ge.s32.totalorder %s1277_s20, 4   ;;  %s1410_s24 = smov %s1104_s25 }
 0x30a   : > { %s1411_s25 = smov %s1108_s26  ;;  %s1412_s26 = smov %s1287_s12 }
 0x30b   : > { %s1413_s27 = smov %s1277_s20  ;;  %21 = sbr.rel (!%p19_p10) target bundleno = 5 (0x5), region = 100 }
 0x312   :  { %627 = vsyncpa [#allocation3], 1 }
 0x313   :  { %629 = vsyncpa [#allocation3 + $0x1], 1 }
 0x314   :  { %630 = vsyncpa [#allocation5], 1 }
 0x315   :  { %631 = vsyncpa [#allocation8], 1 }

// kernel: fc_relu_reg_forward.1
= control target key start
LH: loop header
LB: loop body
LE: loop exit
PB: predicated region body
PF: predicated region fallthrough
CT: control target
= control target key end

     0   :  { %12 = vsyncpa [#allocation3], 0  ;;  %s1388_s0 = inlined_call_operand.hbm [shape: f32[16,8], index: 0, kind: input, shape index: {}]   ;;  %s1389_s1 = inlined_call_operand.hbm [shape: f32[8,128], index: 1, kind: input, shape index: {}]   ;;  %s1390_s2 = inlined_call_operand.vmem [shape: f32[1,128], index: 2, kind: input, shape index: {}]   ;;  %s1391_s3 = inlined_call_operand.hbm [shape: f32[128,128], index: 3, kind: input, shape index: {}]   ;;  %s1392_s4 = inlined_call_operand.vmem [shape: f32[1,128], index: 4, kind: input, shape index: {}]   ;;  %s1393_s5 = inlined_call_operand.hbm [shape: f32[128,128], index: 5, kind: input, shape index: {}]   ;;  %s1394_s6 = inlined_call_operand.vmem [shape: f32[1,128], index: 6, kind: input, shape index: {}]   ;;  %s1395_s7 = inlined_call_operand.vmem [shape: f32[16,128], index: 7, kind: output, shape index: {}]  }
   0x1   :  { %14 = vsyncpa [#allocation3 + $0x1], 0 }
   0x2   :  { %15 = vsyncpa [#allocation5], 0 }
   0x3   :  { %16 = vsyncpa [#allocation8], 0  ;;  %s1163_s24 = smov 0   ;;  %s1165_s25 = smov 0  }
   0x4   :  { %s1167_s26 = smov 0   ;;  %s1169_s27 = smov 0  }
   0x5 LB: > { %s1182_s28 = sadd.s32 4294967295, %s1112_s27   ;;  %p42_p0 = scmp.ne.s32.totalorder %s1104_s25, %s1100_s24  ;;  %s1112_s27 = sphi %s1169_s27, %s1413_s27   ;;  %s1108_s26 = sphi %s1167_s26, %s1412_s26   ;;  %s1104_s25 = sphi %s1165_s25, %s1411_s25   ;;  %s1100_s24 = sphi %s1163_s24, %s1410_s24  }
   0x6   : > { %p1396_p1 = scmp.eq.s32.totalorder %s1182_s28, 0  ;;  %p703_p2 = scmp.ge.s32.totalorder %s1112_s27, 1 }
   0x7   : > { %p205_p3 = scmp.lt.s32.totalorder %s1112_s27, 3  ;;  %s1114_s8 = smov [#allocation4]  }
   0x8   : > { %p1190_p4 = por %p1396_p1, %p42_p0  ;;  %s218_s9 = sshll.u32 %s1114_s8, 4  ;;  %s219_s9 = int_to_ptr.vmem [resolvable:$true] %s218_s9 }
   0x9   : > { %p1194_p5 = pnand %p703_p2, %p205_p3  ;;  %s1115_s10 = smov [#allocation6]  }
   0xa   : > { %s1399_s29 = scalar_select %p1190_p4, 1, 0 }
   0xb   : > { %s1400_s30 = scalar_select %p1194_p5, 1, 0 }
   0xc   : > { %p895_p6 = pneg %p1194_p5  ;;  %s231_s11 = sshll.u32 %s1115_s10, 4  ;;  %s1206_s11 = int_to_ptr.vmem [resolvable:$true] %s231_s11 }
   0xd   : > { %s1116_s13 = smov [#allocation7]   ;;  %s956_s17 = scalar_lea.hbm %s1389_s1, 128 }
   0xe   : > { %p1202_p7 = pnand %p895_p6, %p1396_p1  ;;  %s1208_s14 = sshll.u32 %s1116_s13, 4  ;;  %s248_s14 = int_to_ptr.vmem [resolvable:$true] %s1208_s14 }
   0xf   : > { %p957_p8 = scmp.ne.s32.totalorder %s1389_s1, %s956_s17  ;;  %p963_p12 = scmp.lt.u32.totalorder %s956_s17, %s1389_s1 }
  0x10   : > { %p1218_p9 = pneg %p1202_p7 }
  0x12   : > { %p959_p10 = pnand %p1218_p9, %p957_p8 }
  0x14   : > { %p960_p11 = pneg %p959_p10 }
  0x16   : > { %p965_p13 = pnand %p963_p12, %p960_p11 }
  0x18   : > { %968 = shalt.err (!%p965_p13)
}
  0x19   : > { %s969_s23 = scalar_lea.vmem %s219_s9, 128  ;;  %p977_p6 = scmp.lt.s32.totalorder %s219_s9, %s219_s9 }
  0x1a   : > { %p970_p0 = scmp.ne.s32.totalorder %s219_s9, %s969_s23  ;;  %p978_p1 = scmp.lt.s32.totalorder %s969_s23, %s969_s23 }
  0x1c   : > { %p972_p2 = pnand %p970_p0, %p1218_p9  ;;  %p979_p4 = por %p978_p1, %p977_p6 }
  0x1e   : > { %p973_p3 = pneg %p972_p2 }
  0x20   : > { %p980_p5 = pnand %p979_p4, %p973_p3 }
  0x22   : > { %983 = shalt.err (!%p980_p5)
}
  0x23   : > { %898 = dma.hbm_to_vmem [thread:$0]  (!%p1202_p7), %s1389_s1, 128, %s219_s9, [#allocation5]  }
  0x24   : > { %s984_s15 = scalar_lea.hbm %s1391_s3, 2048 }
  0x25   : > { %p985_p8 = scmp.ne.s32.totalorder %s1391_s3, %s984_s15  ;;  %p991_p4 = scmp.lt.u32.totalorder %s984_s15, %s1391_s3 }
  0x27   : > { %p987_p10 = pnand %p985_p8, %p1218_p9 }
  0x29   : > { %p988_p1 = pneg %p987_p10 }
  0x2b   : > { %p993_p5 = pnand %p991_p4, %p988_p1 }
  0x2d   : > { %996 = shalt.err (!%p993_p5)
}
  0x2e   : > { %s997_s9 = scalar_lea.vmem %s1206_s11, 2048  ;;  %p1005_p0 = scmp.lt.s32.totalorder %s1206_s11, %s1206_s11 }
  0x2f   : > { %p998_p11 = scmp.ne.s32.totalorder %s1206_s11, %s997_s9  ;;  %p1006_p2 = scmp.lt.s32.totalorder %s997_s9, %s997_s9 }
  0x31   : > { %p1000_p12 = pnand %p998_p11, %p1218_p9  ;;  %p1007_p3 = por %p1006_p2, %p1005_p0 }
  0x33   : > { %p1001_p13 = pneg %p1000_p12 }
  0x35   : > { %p1008_p6 = pnand %p1007_p3, %p1001_p13 }
  0x37   : > { %1011 = shalt.err (!%p1008_p6)
}
  0x38   : > { %s1117_s21 = smov 128   ;;  %s1118_s22 = smov 8  }
  0x39   : > { %901 = dma.hbm_to_vmem [thread:$0]  (!%p1202_p7), %s1391_s3, 2048, %s1206_s11, [#allocation5], %s1117_s21, %s1117_s21, %s1118_s22  }
  0x3a   : > { %s1012_s13 = scalar_lea.hbm %s1393_s5, 2048 }
  0x3b   : > { %p1013_p8 = scmp.ne.s32.totalorder %s1393_s5, %s1012_s13  ;;  %p1019_p4 = scmp.lt.u32.totalorder %s1012_s13, %s1393_s5 }
  0x3d   : > { %p1015_p10 = pnand %p1013_p8, %p1218_p9 }
  0x3f   : > { %p1016_p1 = pneg %p1015_p10 }
  0x41   : > { %p1021_p5 = pnand %p1019_p4, %p1016_p1 }
  0x43   : > { %1024 = shalt.err (!%p1021_p5)
}
  0x44   : > { %s1025_s19 = scalar_lea.vmem %s248_s14, 2048  ;;  %p1033_p0 = scmp.lt.s32.totalorder %s248_s14, %s248_s14 }
  0x45   : > { %p1026_p11 = scmp.ne.s32.totalorder %s248_s14, %s1025_s19  ;;  %p1034_p2 = scmp.lt.s32.totalorder %s1025_s19, %s1025_s19 }
  0x47   : > { %p1028_p12 = pnand %p1026_p11, %p1218_p9  ;;  %p1035_p3 = por %p1034_p2, %p1033_p0 }
  0x49   : > { %p1029_p13 = pneg %p1028_p12 }
  0x4b   : > { %p1036_p6 = pnand %p1035_p3, %p1029_p13 }
  0x4d   : > { %1039 = shalt.err (!%p1036_p6)
}
  0x4e   : > { %904 = dma.hbm_to_vmem [thread:$0]  (!%p1202_p7), %s1393_s5, 2048, %s248_s14, [#allocation8], %s1117_s21, %s1117_s21, %s1118_s22  }
  0x4f   : > { %s1277_s20 = sadd.s32 1, %s1112_s27   ;;  %s29_s24 = sadd.s32 1, %s1108_s26 }
  0x50   : > { %s26_s23 = ssub.s32 %s1112_s27, %s1277_s20  ;;  %p36_p8 = scmp.ne.s32.totalorder %s1108_s26, %s1104_s25 }
  0x51   : > { %p27_p9 = scmp.eq.s32.totalorder %s26_s23, 0  ;;  %p37_p10 = scmp.eq.s32.totalorder %s1112_s27, 0 }
  0x52   : > { %p912_p1 = scmp.lt.s32.totalorder %s1112_s27, 2  ;;  %s264_s8 = sand.u32 1, %s1108_s26  }
  0x53   : > { %s1287_s12 = scalar_select %p27_p9, %s1108_s26, %s29_s24  }
  0x54   : > { %p38_p4 = por %p37_p10, %p36_p8  ;;  %s708_s10 = sshll.u32 %s264_s8, 3 }
  0x55   : > { %s709_s13 = sshll.u32 %s1112_s27, 7  ;;  %s268_s14 = scalar_lea.vmem [#allocation2], %s708_s10 }
  0x56   : > { %s1294_s17 = scalar_lea.hbm %s1388_s0, %s709_s13  ;;  %s275_s21 = sshll.u32 %s268_s14, 4  ;;  %s1296_s21 = int_to_ptr.vmem [resolvable:$true] %s275_s21 }
  0x57   : > { %p1298_p7 = pnand %p912_p1, %p38_p4  ;;  %s265_s27 = scalar_lea.sflag [#allocation3], %s264_s8 }
  0x58   : > { %s1040_s18 = scalar_lea.hbm %s1294_s17, 128  ;;  %s1045_s9 = scalar_lea.hbm %s1388_s0, 256 }
  0x59   : > { %p1041_p5 = scmp.ne.s32.totalorder %s1294_s17, %s1040_s18  ;;  %p1042_p11 = pneg %p1298_p7 }
  0x5a   : > { %p1046_p0 = scmp.lt.u32.totalorder %s1294_s17, %s1388_s0  ;;  %p1047_p2 = scmp.lt.u32.totalorder %s1045_s9, %s1040_s18 }
  0x5b   : > { %p1043_p12 = pnand %p1042_p11, %p1041_p5  ;;  %p1049_p6 = scmp.lt.u32.totalorder %s1040_s18, %s1294_s17 }
  0x5c   : > { %p1048_p3 = por %p1047_p2, %p1046_p0 }
  0x5d   : > { %p1044_p13 = pneg %p1043_p12 }
  0x5e   : > { %p1050_p9 = por %p1049_p6, %p1048_p3 }
  0x60   : > { %p1051_p8 = pnand %p1050_p9, %p1044_p13 }
  0x62   : > { %1054 = shalt.err (!%p1051_p8)
}
  0x63   : > { %s1055_s8 = scalar_lea.vmem %s1296_s21, 128  ;;  %s1119_s10 = smov [#allocation2]  }
  0x64   : > { %p1056_p10 = scmp.ne.s32.totalorder %s1296_s21, %s1055_s8  ;;  %s1060_s13 = sshll.u32 %s1119_s10, 4  ;;  %s1061_s13 = int_to_ptr.vmem [resolvable:$false] %s1060_s13 }
  0x65   : > { %s1062_s15 = scalar_lea.vmem %s1061_s13, 256  ;;  %p1063_p5 = scmp.lt.s32.totalorder %s1296_s21, %s1061_s13 }
  0x66   : > { %p1058_p1 = pnand %p1056_p10, %p1042_p11  ;;  %p1064_p12 = scmp.lt.s32.totalorder %s1062_s15, %s1055_s8 }
  0x68   : > { %p1059_p4 = pneg %p1058_p1  ;;  %p1065_p0 = por %p1064_p12, %p1063_p5 }
  0x6a   : > { %p1066_p2 = pnand %p1065_p0, %p1059_p4 }
  0x6c   : > { %1069 = shalt.err (!%p1066_p2)
}
  0x6d   : > { %908 = dma.hbm_to_vmem [thread:$0]  (!%p1298_p7), %s1294_s17, 128, %s1296_s21, %s265_s27  }
  0x6e   : > { %p1404_p13 = scmp.ne.s32.totalorder %s1400_s30, 0 }
  0x6f   : > { %s286_s16 = sand.u32 (!%p1404_p13), 1, %s1104_s25   ;;  %p1405_p11 = scmp.ne.s32.totalorder (!%p1404_p13), %s1399_s29, 0 }
  0x70   : > { %284 = sbr.rel (%p1404_p13) target bundleno = 777 (0x309), region = 48  ;;  %s711_s14 = sshll.u32 (!%p1404_p13), %s286_s16, 3 }
  0x71   : > { %s287_s18 = scalar_lea.sflag (!%p1404_p13), [#allocation3], %s286_s16  ;;  %s290_s19 = scalar_lea.vmem (!%p1404_p13), [#allocation2], %s711_s14 }
  0x77   : > { %1087 = dma.done.wait (%p1405_p11), %s287_s18, 128  }
  0x78   : > { %1089 = vsyncadd (%p1405_p11), %s287_s18, 4294967168  ;;  %p1406_p3 = scmp.eq.s32.totalorder %s1182_s28, 0 }
  0x7a   : > { %1091 = dma.done.wait (%p1406_p3), [#allocation5], 2176   ;;  %p1407_p6 = pmov %p1406_p3 }
  0x7b   : > { %p1408_p7 = pmov %p1406_p3 }
  0x7c   : > { %1093 = vsyncadd (%p1407_p6), [#allocation5], 4294965120 }
  0x7d   : > { %1095 = dma.done.wait (%p1408_p7), [#allocation8], 2048   ;;  %p1409_p9 = pmov %p1406_p3 }
  0x7e   : > { %v1120_v0 = vmov 0.0   ;;  %vm1121_vm0 = vmmov 0   ;;  %v1122_v1 = vmov 0.0|0.0   ;;  %vm345_vm1 = vcmask 64512   ;;  %v337_v2 = vld [vmem:[#allocation4] sm:$0xff]  ;;  %v336_v3 = vld [vmem:[%s290_s19] sm:$0xff] }
  0x7f   : > { %1097 = vsyncadd (%p1409_p9), [#allocation8], 4294965248  ;;  %758 = vmatprep.subr.mxu0 %v1120_v0  ;;  %760 = vmatprep.mubr.msk.f32.mxu0 %vm1121_vm0, %v1120_v0  ;;  %v420_v4 = vld [vmem:[#allocation6] sm:$0xff]  ;;  %v421_v5 = vld [vmem:[#allocation6 + $0x8] sm:$0xff]  ;;  %p332_p8 = scmp.lt.s32.totalorder %s1182_s28, 1 }
  0x80   : > { %833 = vmatprep.subr.bf16.mxu1 %v1122_v1  ;;  %795 = vmatprep.mubr.msk.f32.mxu1 %vm1121_vm0, %v1120_v0  ;;  %v422_v6 = vld [vmem:[#allocation6 + $0x10] sm:$0xff]  ;;  %v423_v7 = vld [vmem:[#allocation6 + $0x18] sm:$0xff]  ;;  %v834_v8 = vpack.c.bf16 %v421_v5, %v420_v4  ;;  %v424_v10 = vld [vmem:[#allocation6 + $0x20] sm:$0xff] }
  0x81   : > { %759 = vmatpush3.msra.mxu0 %v337_v2  ;;  %v837_v9 = vpack.c.bf16 %v423_v7, %v422_v6  ;;  %v425_v11 = vld [vmem:[#allocation6 + $0x28] sm:$0xff]  ;;  %v426_v13 = vld [vmem:[#allocation6 + $0x30] sm:$0xff]  ;;  %v427_v14 = vld [vmem:[#allocation6 + $0x38] sm:$0xff]  ;;  %s1415_s28 = smov (!%p332_p8, %s1182_s28), 1 }
  0x82   : > { %761 = vmatmul.mubr.msk.f32.vlgmr.msra.gmra.mrb[0].mxu0 %vm345_vm1, %v336_v3  ;;  %857 = vmatprep.subr.bf16.mxu0 %v1122_v1  ;;  %v840_v12 = vpack.c.bf16 %v425_v11, %v424_v10  ;;  %v843_v15 = vpack.c.bf16 %v427_v14, %v426_v13  ;;  %v428_v16 = vld [vmem:[#allocation6 + $0x40] sm:$0xff]  ;;  %v429_v17 = vld [vmem:[#allocation6 + $0x48] sm:$0xff]  ;;  %v430_v19 = vld [vmem:[#allocation6 + $0x50] sm:$0xff]  ;;  %s715_s22 = sshll.u32 %s1415_s28, 3 }
  0x83   : > { %830 = vmatprep.mubr.msk.f32.mxu0 %vm1121_vm0, %v1120_v0  ;;  %835 = vmatpush3.bf16.msra.mxu1 %v834_v8  ;;  %v846_v18 = vpack.c.bf16 %v429_v17, %v428_v16  ;;  %v431_v20 = vld [vmem:[#allocation6 + $0x58] sm:$0xff]  ;;  %v432_v22 = vld [vmem:[#allocation6 + $0x60] sm:$0xff]  ;;  %v433_v23 = vld [vmem:[#allocation6 + $0x68] sm:$0xff]  ;;  %s335_s24 = scalar_lea.vmem %s1395_s7, %s715_s22 }
  0x84   : > { %836 = vmatprep.subr.bf16.mxu1 %v1122_v1  ;;  %v849_v21 = vpack.c.bf16 %v431_v20, %v430_v19  ;;  %v852_v24 = vpack.c.bf16 %v433_v23, %v432_v22  ;;  %v434_v25 = vld [vmem:[#allocation6 + $0x70] sm:$0xff]  ;;  %v435_v26 = vld [vmem:[#allocation6 + $0x78] sm:$0xff]  ;;  %v514_v28 = vld [vmem:[#allocation7] sm:$0xff] }
  0x85   : > { %v855_v27 = vpack.c.bf16 %v435_v26, %v434_v25  ;;  %v515_v29 = vld [vmem:[#allocation7 + $0x8] sm:$0xff]  ;;  %v516_v30 = vld [vmem:[#allocation7 + $0x10] sm:$0xff]  ;;  %v517_v32 = vld [vmem:[#allocation7 + $0x18] sm:$0xff] }
  0x86   : > { %v858_v31 = vpack.c.bf16 %v515_v29, %v514_v28  ;;  %v861_v33 = vpack.c.bf16 %v517_v32, %v516_v30  ;;  %v518_v34 = vld [vmem:[#allocation7 + $0x20] sm:$0xff]  ;;  %v519_v35 = vld [vmem:[#allocation7 + $0x28] sm:$0xff]  ;;  %v520_v37 = vld [vmem:[#allocation7 + $0x30] sm:$0xff] }
  0x87   : > { %838 = vmatpush3.bf16.msra.mxu1 %v837_v9  ;;  %v864_v36 = vpack.c.bf16 %v519_v35, %v518_v34  ;;  %v521_v38 = vld [vmem:[#allocation7 + $0x38] sm:$0xff]  ;;  %v522_v40 = vld [vmem:[#allocation7 + $0x40] sm:$0xff]  ;;  %v523_v41 = vld [vmem:[#allocation7 + $0x48] sm:$0xff] }
  0x88   : > { %839 = vmatprep.subr.bf16.mxu1 %v1122_v1  ;;  %859 = vmatpush3.bf16.msra.mxu0 %v858_v31  ;;  %v867_v39 = vpack.c.bf16 %v521_v38, %v520_v37  ;;  %v870_v42 = vpack.c.bf16 %v523_v41, %v522_v40  ;;  %v524_v43 = vld [vmem:[#allocation7 + $0x50] sm:$0xff]  ;;  %v525_v44 = vld [vmem:[#allocation7 + $0x58] sm:$0xff]  ;;  %v526_v46 = vld [vmem:[#allocation7 + $0x60] sm:$0xff] }
  0x89   : > { %860 = vmatprep.subr.bf16.mxu0 %v1122_v1  ;;  %v873_v45 = vpack.c.bf16 %v525_v44, %v524_v43  ;;  %v527_v47 = vld [vmem:[#allocation7 + $0x68] sm:$0xff]  ;;  %v528_v54 = vld [vmem:[#allocation7 + $0x70] sm:$0xff]  ;;  %v529_v55 = vld [vmem:[#allocation7 + $0x78] sm:$0xff] }
  0x8a   : > { %v876_v48 = vpack.c.bf16 %v527_v47, %v526_v46  ;;  %v716_v49 = vld [vmem:[%s1390_s2] ss:$0 sm:$0xff]  ;;  %v879_v56 = vpack.c.bf16 %v529_v55, %v528_v54 }
  0x8b   : > { %841 = vmatpush3.bf16.msra.mxu1 %v840_v12  ;;  %v718_v57 = vld [vmem:[%s1392_s4] ss:$0 sm:$0xff] }
  0x8c   : > { %842 = vmatprep.subr.bf16.mxu1 %v1122_v1  ;;  %862 = vmatpush3.bf16.msra.mxu0 %v861_v33  ;;  %v719_v62 = vld [vmem:[%s1394_s6] ss:$0 sm:$0xff] }
  0x8d   : > { %863 = vmatprep.subr.bf16.mxu0 %v1122_v1 }
  0x8f   : > { %844 = vmatpush3.bf16.msra.mxu1 %v843_v15 }
  0x90   : > { %845 = vmatprep.subr.bf16.mxu1 %v1122_v1  ;;  %865 = vmatpush3.bf16.msra.mxu0 %v864_v36 }
  0x91   : > { %866 = vmatprep.subr.bf16.mxu0 %v1122_v1 }
  0x93   : > { %847 = vmatpush3.bf16.msra.mxu1 %v846_v18 }
  0x94   : > { %848 = vmatprep.subr.bf16.mxu1 %v1122_v1  ;;  %868 = vmatpush3.bf16.msra.mxu0 %v867_v39 }
  0x95   : > { %869 = vmatprep.subr.bf16.mxu0 %v1122_v1 }
  0x97   : > { %850 = vmatpush3.bf16.msra.mxu1 %v849_v21 }
  0x98   : > { %851 = vmatprep.subr.bf16.mxu1 %v1122_v1  ;;  %871 = vmatpush3.bf16.msra.mxu0 %v870_v42 }
  0x99   : > { %872 = vmatprep.subr.bf16.mxu0 %v1122_v1 }
  0x9b   : > { %853 = vmatpush3.bf16.msra.mxu1 %v852_v24 }
  0x9c   : > { %854 = vmatprep.subr.bf16.mxu1 %v1122_v1  ;;  %874 = vmatpush3.bf16.msra.mxu0 %v873_v45 }
  0x9d   : > { %875 = vmatprep.subr.bf16.mxu0 %v1122_v1 }
  0x9f   : > { %856 = vmatpush3.bf16.msra.mxu1 %v855_v27 }
  0xa0   : > { %877 = vmatpush3.bf16.msra.mxu0 %v876_v48 }
  0xa1   : > { %878 = vmatprep.subr.bf16.mxu0 %v1122_v1 }
  0xa4   : > { %880 = vmatpush3.bf16.msra.mxu0 %v879_v56 }
 0x155   : > { %v415_v50 = vpop.f32.mrb[0].mxu0 }
 0x156   : > { %v416_v51 = vadd.f32 %v716_v49, %v415_v50  ;;  %v762_v52 = vpop.f32.mrb[1].mxu0 }
 0x158   : > { %v419_v53 = vmax.f32 %v416_v51, 0.0 }
 0x15a   : > { %796 = vmatmul.mubr.f32.vlgmr.msra.gmra.mrb[0].mxu1 %v419_v53 }
 0x22d   : > { %v509_v58 = vpop.f32.mrb[0].mxu1 }
 0x22e   : > { %v510_v59 = vadd.f32 %v718_v57, %v509_v58  ;;  %v797_v60 = vpop.f32.mrb[1].mxu1 }
 0x230   : > { %v513_v61 = vmax.f32 %v510_v59, 0.0 }
 0x232   : > { %831 = vmatmul.mubr.f32.vlgmr.msra.gmra.mrb[2].mxu0 %v513_v61 }
 0x305   : > { %v603_v63 = vpop.f32.mrb[2].mxu0 }
 0x306   : > { %v604_v0 = vadd.f32 %v719_v62, %v603_v63  ;;  %v832_v1 = vpop.f32.mrb[3].mxu0 }
 0x308   : > { %607 = vst [vmem:[%s335_s24] sm:$0xff] %v604_v0 }
 0x309 PF: > { %p19_p10 = scmp.ge.s32.totalorder %s1277_s20, 4   ;;  %s1410_s24 = smov %s1104_s25 }
 0x30a   : > { %s1411_s25 = smov %s1108_s26  ;;  %s1412_s26 = smov %s1287_s12 }
 0x30b   : > { %s1413_s27 = smov %s1277_s20  ;;  %21 = sbr.rel (!%p19_p10) target bundleno = 5 (0x5), region = 100 }
 0x312   :  { %627 = vsyncpa [#allocation3], 1 }
 0x313   :  { %629 = vsyncpa [#allocation3 + $0x1], 1 }
 0x314   :  { %630 = vsyncpa [#allocation5], 1 }
 0x315   :  { %631 = vsyncpa [#allocation8], 1 }

</bundles_post_ra>
